<compile_context>
chip_gen: v7x
topology: tpu7x:2x2x1
jax: 0.10.0
libtpu: 0.0.40
codegen_flags: <defaults>
</compile_context>

<pallas_src>
import math

import jax
import jax.numpy as jnp
from jax import lax
from jax.experimental import pallas as pl
from jax.experimental.pallas import tpu as pltpu

HIDDEN = 64

# Conservative per-step VMEM budget / scoped limit cap: safe on v7x (64 MiB per
# TensorCore); v5e/v6e have 128 MiB so this is never the binding constraint.
_VMEM_BUDGET = 44 << 20
_VMEM_CAP = 56 << 20


def _softplus(z):
    # PyTorch nn.Softplus(beta=1, threshold=20): z if z > 20 else log1p(exp(z)).
    # NOTE: exp(z) is still evaluated (and may be inf) for z > 20; that branch
    # is discarded by the select and log1p(inf)=inf produces no NaN.  Keep this
    # as a jnp.where select — do NOT rewrite it as arithmetic that could form
    # 0*inf.
    return jnp.where(z > 20.0, z, jnp.log1p(jnp.exp(z)))


def qac_critic_kernel(x_ref, w1_ref, b1_ref, w2_ref, b2_ref, w3_ref, b3_ref,
                      o_ref):
    """Fused 3-layer MLP, computed in transposed (features, batch) orientation.

    All matmuls are plain W(out_f, in_f) @ h(in_f, TB) on the MXU with f32
    accumulation; matmul operands stay in the streamed dtype (f32 or bf16);
    bias add / ReLU / softplus are f32.  The output store is lane-dense
    (out, TB) — the batch tile sits on the 128-lane axis (matters most on
    v5e's single vst slot).
    """
    x = x_ref[...]
    w1 = w1_ref[...]
    w2 = w2_ref[...]
    w3 = w3_ref[...]
    cdt = w1.dtype                                   # matmul operand dtype

    # fc1 (transposed):  W1 (64, in) . x^T (in, TB) -> (64, TB).
    # The only activation-sized cross-lane transpose per step is of this small
    # streamed (TB, in) tile; h never needs transposing.
    h = lax.dot_general(w1, x,
                        dimension_numbers=(((1,), (1,)), ((), ())),
                        preferred_element_type=jnp.float32)
    h = jnp.maximum(h + b1_ref[...], 0.0).astype(cdt)        # b1: (64, 1) f32

    # fc2:  W2 (64, 64) @ h (64, TB) -> (64, TB)
    h = jnp.dot(w2, h, preferred_element_type=jnp.float32)
    h = jnp.maximum(h + b2_ref[...], 0.0).astype(cdt)        # b2: (64, 1) f32

    # fc3:  W3 (out, 64) @ h (64, TB) -> (out, TB), lane-dense store.
    z = jnp.dot(w3, h, preferred_element_type=jnp.float32)
    z = z + b3_ref[...]                                       # b3: (out, 1) f32

    o_ref[...] = _softplus(z).astype(o_ref.dtype)


def _step_vmem_bytes(tb, in_size, out_size, x_itemsize, param_bytes):
    """Rough per-step VMEM footprint used for tile sizing / vmem_limit."""
    x_tile = tb * in_size * x_itemsize                 # streamed input tile
    out_tile = out_size * tb * 4                       # lane-dense f32 output
    # In-kernel temporaries: ~two live (64, tb) f32 stages (+ narrow copy for
    # the next dot) plus the pre-softplus (out, tb) f32 block.
    interm = 3 * HIDDEN * tb * 4 + out_size * tb * 4
    # Double-buffered pipelined operands + params (x2 for safety) + slack.
    return 2 * (x_tile + out_tile) + 2 * param_bytes + interm + (2 << 20)


def _choose_tb(batch, block_batch, in_size, out_size, x_itemsize, param_bytes):
    # Latency regime: a single block whose dims equal the full array dims.
    if batch <= min(512, block_batch):
        return batch
    # Throughput regime: multi-MiB tiles (85%+ of HBM roofline vs ~30% for
    # 128 KiB-class tiles) but capped so the grid has >= 2 steps — a 1-step
    # grid would idle the second TensorCore on v7x.
    tb = min(block_batch, -(-batch // 2))
    tb = max(128, (tb // 128) * 128)                   # lane-aligned (out, tb)
    while tb > 128 and _step_vmem_bytes(tb, in_size, out_size, x_itemsize,
                                        param_bytes) > _VMEM_BUDGET:
        tb = max(128, ((tb // 2) // 128) * 128)
    return tb


def qac_critic_forward(x, params, *, block_batch=8192, use_bf16=True,
                       transposed_output=False, x_buffers=2):
    """Fused QAC_critic forward.

    x: (batch, input_size) float32.
    Returns (batch, output_size) float32, or (output_size, batch) when
    transposed_output=True (skips the extra wrapper-transpose HBM pass —
    preferred when the consumer can take the transposed layout).

    use_bf16 streams x and the weights as bf16 (halves the dominant HBM input
    traffic and MXU passes); accumulation and elementwise math stay f32.
    Pass use_bf16=False for bit-faithful f32 semantics of the PyTorch module.
    """
    batch, in_size = x.shape
    out_size = params["w3"].shape[0]              # weights are PyTorch (out, in)

    w1, w2, w3 = params["w1"], params["w2"], params["w3"]
    b1 = params["b1"].astype(jnp.float32)
    b2 = params["b2"].astype(jnp.float32)
    b3 = params["b3"].astype(jnp.float32)
    cdt = jnp.bfloat16 if use_bf16 else jnp.float32
    x, w1, w2, w3 = (a.astype(cdt) for a in (x, w1, w2, w3))

    param_bytes = sum(int(a.size) * a.dtype.itemsize
                      for a in (w1, b1, w2, b2, w3, b3))
    tb = _choose_tb(batch, block_batch, in_size, out_size,
                    x.dtype.itemsize, param_bytes)
    # Ragged last block handled by partial DMAs: no wrapper jnp.pad, and OOB
    # output columns of the last block are never written back.
    grid = (pl.cdiv(batch, tb),)

    # x is the only streamed operand; deepen its pipeline only if a profile
    # shows exposed DMA (mainly relevant on v7x's 3.2 TB/s HBM).
    x_spec_kwargs = {}
    if x_buffers != 2:
        x_spec_kwargs["pipeline_mode"] = pl.Buffered(x_buffers)
    x_spec = pl.BlockSpec((tb, in_size), lambda i: (i, 0), **x_spec_kwargs)

    vmem_limit = int(min(
        _VMEM_CAP,
        max(32 << 20,
            _step_vmem_bytes(tb, in_size, out_size, x.dtype.itemsize,
                             param_bytes) * 5 // 4)))

    flops = 2 * batch * (in_size * HIDDEN + HIDDEN * HIDDEN + HIDDEN * out_size)
    bytes_accessed = (batch * in_size * x.dtype.itemsize
                      + batch * out_size * 4 + param_bytes)

    out_t = pl.pallas_call(
        qac_critic_kernel,
        out_shape=jax.ShapeDtypeStruct((out_size, batch), jnp.float32),
        grid=grid,
        in_specs=[
            x_spec,                                       # x: batch-streamed
            pl.BlockSpec(w1.shape, lambda i: (0, 0)),     # params: constant
            pl.BlockSpec(b1.shape, lambda i: (0, 0)),     #   index maps ->
            pl.BlockSpec(w2.shape, lambda i: (0, 0)),     #   VMEM-resident
            pl.BlockSpec(b2.shape, lambda i: (0, 0)),     #   across the grid
            pl.BlockSpec(w3.shape, lambda i: (0, 0)),
            pl.BlockSpec(b3.shape, lambda i: (0, 0)),
        ],
        out_specs=pl.BlockSpec((out_size, tb), lambda i: (0, i)),
        compiler_params=pltpu.CompilerParams(
            dimension_semantics=("parallel",),
            vmem_limit_bytes=vmem_limit,
        ),
        cost_estimate=pl.CostEstimate(
            flops=flops,
            transcendentals=2 * batch * out_size,
            bytes_accessed=bytes_accessed,
        ),
    )(x, w1, b1, w2, b2, w3, b3)

    if transposed_output:
        return out_t                     # (out, batch): no extra HBM pass
    return out_t.T                       # module interface: (batch, out)


def init_params(key, input_size, output_size):
    """Deterministic init mimicking the PyTorch module's __init__.

    Weights are PyTorch-native (out_features, in_features); biases are stored
    as (out_features, 1) columns for the transposed-orientation kernel.
    """
    ks = jax.random.split(key, 6)

    def kaiming_relu(k, fan_out, fan_in):
        # kaiming_uniform_(nonlinearity='relu'): bound = sqrt(6 / fan_in).
        bound = math.sqrt(6.0 / fan_in)
        return jax.random.uniform(k, (fan_out, fan_in), jnp.float32, -bound, bound)

    def default_weight(k, fan_out, fan_in):
        # nn.Linear default: kaiming_uniform_(a=sqrt(5)) -> bound = 1/sqrt(fan_in).
        bound = 1.0 / math.sqrt(fan_in)
        return jax.random.uniform(k, (fan_out, fan_in), jnp.float32, -bound, bound)

    def default_bias(k, fan_out, fan_in):
        bound = 1.0 / math.sqrt(fan_in)
        return jax.random.uniform(k, (fan_out, 1), jnp.float32, -bound, bound)

    return {
        "w1": kaiming_relu(ks[0], HIDDEN, input_size),
        "b1": default_bias(ks[1], HIDDEN, input_size),
        "w2": kaiming_relu(ks[2], HIDDEN, HIDDEN),
        "b2": default_bias(ks[3], HIDDEN, HIDDEN),
        "w3": default_weight(ks[4], output_size, HIDDEN),
        "b3": default_bias(ks[5], output_size, HIDDEN),
    }


def qac_critic_ref(x, params, *, use_bf16=False):
    """Pure-JAX reference.  use_bf16=False is exactly the f32 PyTorch forward;
    use_bf16=True mirrors the kernel's bf16-operand / f32-accumulation policy
    so the comparison isolates kernel bugs from quantization."""
    cdt = jnp.bfloat16 if use_bf16 else jnp.float32
    w1, w2, w3 = (params[k].astype(cdt) for k in ("w1", "w2", "w3"))
    b1, b2, b3 = (params[k].astype(jnp.float32) for k in ("b1", "b2", "b3"))
    h = jnp.dot(x.astype(cdt), w1.T, preferred_element_type=jnp.float32)
    h = jnp.maximum(h + b1.T, 0.0).astype(cdt)
    h = jnp.dot(h, w2.T, preferred_element_type=jnp.float32)
    h = jnp.maximum(h + b2.T, 0.0).astype(cdt)
    z = jnp.dot(h, w3.T, preferred_element_type=jnp.float32) + b3.T
    return jnp.where(z > 20.0, z, jnp.log1p(jnp.exp(z)))


if __name__ == "__main__":
    INPUT_SIZE = 32
    OUTPUT_SIZE = 8

    key = jax.random.PRNGKey(0)
    k_params, k_x1, k_x2, k_x3 = jax.random.split(key, 4)
    params = init_params(k_params, INPUT_SIZE, OUTPUT_SIZE)

    # 1) Small latency-style batch, exact f32 path (matches the PyTorch module).
    x_small = jax.random.normal(k_x1, (8, INPUT_SIZE), jnp.float32)
    out = jax.block_until_ready(qac_critic_forward(x_small, params,
                                                   use_bf16=False))
    ref = qac_critic_ref(x_small, params)
    assert out.shape == (8, OUTPUT_SIZE)
    assert jnp.allclose(out, ref, atol=5e-4, rtol=5e-4), \
        "f32 small-batch mismatch vs reference"

    # 2) Ragged multi-block grid (no wrapper padding), f32 path.
    x_med = jax.random.normal(k_x2, (300, INPUT_SIZE), jnp.float32)
    out = jax.block_until_ready(qac_critic_forward(x_med, params,
                                                   block_batch=128,
                                                   use_bf16=False))
    ref = qac_critic_ref(x_med, params)
    assert out.shape == (300, OUTPUT_SIZE)
    assert jnp.allclose(out, ref, atol=5e-4, rtol=5e-4), \
        "f32 ragged-grid mismatch vs reference"

    # 3) Default bf16-streamed path vs a precision-matched reference, and the
    #    transpose-free (out, batch) output layout.
    out_bf = jax.block_until_ready(qac_critic_forward(x_med, params,
                                                      block_batch=128))
    ref_bf = qac_critic_ref(x_med, params, use_bf16=True)
    assert jnp.allclose(out_bf, ref_bf, atol=5e-3, rtol=5e-3), \
        "bf16 ragged-grid mismatch vs precision-matched reference"

    out_t = jax.block_until_ready(qac_critic_forward(x_med, params,
                                                     block_batch=128,
                                                     transposed_output=True))
    assert out_t.shape == (OUTPUT_SIZE, 300)
    assert jnp.allclose(out_t.T, ref_bf, atol=5e-3, rtol=5e-3), \
        "transposed-output mismatch vs precision-matched reference"

    # 4) Large-tile throughput path: default 8192-row tiles, >= 2 grid steps,
    #    ragged last block, bf16 streaming.
    x_big = jax.random.normal(k_x3, (20000, INPUT_SIZE), jnp.float32)
    out_big = jax.block_until_ready(qac_critic_forward(x_big, params))
    ref_big = qac_critic_ref(x_big, params, use_bf16=True)
    assert out_big.shape == (20000, OUTPUT_SIZE)
    assert jnp.allclose(out_big, ref_big, atol=5e-3, rtol=5e-3), \
        "bf16 large-batch mismatch vs precision-matched reference"

    print("KERNEL_OK")
</pallas_src>

<mosaic_0001>
module attributes {stable_mosaic.version = 11 : i64} {
  func.func @qac_critic_kernel(%arg0: i32, %arg1: memref<8x32xf32, #tpu.memory_space<vmem>>, %arg2: memref<64x32xf32, #tpu.memory_space<vmem>>, %arg3: memref<64x1xf32, #tpu.memory_space<vmem>>, %arg4: memref<64x64xf32, #tpu.memory_space<vmem>>, %arg5: memref<64x1xf32, #tpu.memory_space<vmem>>, %arg6: memref<8x64xf32, #tpu.memory_space<vmem>>, %arg7: memref<8x1xf32, #tpu.memory_space<vmem>>, %arg8: memref<8x8xf32, #tpu.memory_space<vmem>>) attributes {dimension_semantics = [#tpu.dimension_semantics<parallel>], iteration_bounds = array<i64: 1>, scalar_prefetch = 0 : i64, scratch_operands = 0 : i64, tpu.core_type = #tpu.core_type<tc>, window_params = [{transform_indices = @transform_0, window_bounds = array<i64: 8, 32>}, {pipeline_mode = #tpu.pipeline_mode<synchronous>, transform_indices = @transform_1, window_bounds = array<i64: 64, 32>}, {pipeline_mode = #tpu.pipeline_mode<synchronous>, transform_indices = @transform_2, window_bounds = array<i64: 64, 1>}, {pipeline_mode = #tpu.pipeline_mode<synchronous>, transform_indices = @transform_3, window_bounds = array<i64: 64, 64>}, {pipeline_mode = #tpu.pipeline_mode<synchronous>, transform_indices = @transform_4, window_bounds = array<i64: 64, 1>}, {pipeline_mode = #tpu.pipeline_mode<synchronous>, transform_indices = @transform_5, window_bounds = array<i64: 8, 64>}, {pipeline_mode = #tpu.pipeline_mode<synchronous>, transform_indices = @transform_6, window_bounds = array<i64: 8, 1>}, {transform_indices = @transform_7, window_bounds = array<i64: 8, 8>}]} {
    %c0 = arith.constant 0 : index
    %c0_0 = arith.constant 0 : index
    %0 = vector.load %arg1[%c0, %c0_0] : memref<8x32xf32, #tpu.memory_space<vmem>>, vector<8x32xf32>
    %c0_1 = arith.constant 0 : index
    %c0_2 = arith.constant 0 : index
    %1 = vector.load %arg2[%c0_1, %c0_2] : memref<64x32xf32, #tpu.memory_space<vmem>>, vector<64x32xf32>
    %c0_3 = arith.constant 0 : index
    %c0_4 = arith.constant 0 : index
    %2 = vector.load %arg4[%c0_3, %c0_4] : memref<64x64xf32, #tpu.memory_space<vmem>>, vector<64x64xf32>
    %c0_5 = arith.constant 0 : index
    %c0_6 = arith.constant 0 : index
    %3 = vector.load %arg6[%c0_5, %c0_6] : memref<8x64xf32, #tpu.memory_space<vmem>>, vector<8x64xf32>
    %cst = arith.constant dense<0.000000e+00> : vector<64x8xf32>
    %4 = tpu.matmul %1, %0, %cst {dimension_numbers = #tpu.dot_dimension_numbers<[1], [1], [0], [0], [0, 0, 1, 0], [], []>} : vector<64x32xf32>, vector<8x32xf32>, vector<64x8xf32> -> vector<64x8xf32>
    %c0_7 = arith.constant 0 : index
    %c0_8 = arith.constant 0 : index
    %5 = vector.load %arg3[%c0_7, %c0_8] : memref<64x1xf32, #tpu.memory_space<vmem>>, vector<64x1xf32>
    %6 = vector.broadcast %5 : vector<64x1xf32> to vector<64x8xf32>
    %7 = arith.addf %4, %6 : vector<64x8xf32>
    %cst_9 = arith.constant 0.000000e+00 : f32
    %8 = vector.broadcast %cst_9 : f32 to vector<64x8xf32>
    %9 = arith.maximumf %7, %8 : vector<64x8xf32>
    %cst_10 = arith.constant dense<0.000000e+00> : vector<64x8xf32>
    %10 = tpu.matmul %2, %9, %cst_10 {dimension_numbers = #tpu.dot_dimension_numbers<[1], [0], [0], [1], [0, 0, 1, 1], [], []>} : vector<64x64xf32>, vector<64x8xf32>, vector<64x8xf32> -> vector<64x8xf32>
    %c0_11 = arith.constant 0 : index
    %c0_12 = arith.constant 0 : index
    %11 = vector.load %arg5[%c0_11, %c0_12] : memref<64x1xf32, #tpu.memory_space<vmem>>, vector<64x1xf32>
    %12 = vector.broadcast %11 : vector<64x1xf32> to vector<64x8xf32>
    %13 = arith.addf %10, %12 : vector<64x8xf32>
    %cst_13 = arith.constant 0.000000e+00 : f32
    %14 = vector.broadcast %cst_13 : f32 to vector<64x8xf32>
    %15 = arith.maximumf %13, %14 : vector<64x8xf32>
    %cst_14 = arith.constant dense<0.000000e+00> : vector<8x8xf32>
    %16 = tpu.matmul %3, %15, %cst_14 {dimension_numbers = #tpu.dot_dimension_numbers<[1], [0], [0], [1], [0, 0, 1, 1], [], []>} : vector<8x64xf32>, vector<64x8xf32>, vector<8x8xf32> -> vector<8x8xf32>
    %c0_15 = arith.constant 0 : index
    %c0_16 = arith.constant 0 : index
    %17 = vector.load %arg7[%c0_15, %c0_16] : memref<8x1xf32, #tpu.memory_space<vmem>>, vector<8x1xf32>
    %18 = vector.broadcast %17 : vector<8x1xf32> to vector<8x8xf32>
    %19 = arith.addf %16, %18 : vector<8x8xf32>
    %cst_17 = arith.constant 2.000000e+01 : f32
    %20 = vector.broadcast %cst_17 : f32 to vector<8x8xf32>
    %21 = arith.cmpf ogt, %19, %20 : vector<8x8xf32>
    %22 = math.exp %19 : vector<8x8xf32>
    %23 = math.log1p %22 : vector<8x8xf32>
    %24 = arith.select %21, %19, %23 : vector<8x8xi1>, vector<8x8xf32>
    %c0_18 = arith.constant 0 : index
    %c0_19 = arith.constant 0 : index
    %25 = vector.load %arg8[%c0_18, %c0_19] : memref<8x8xf32, #tpu.memory_space<vmem>>, vector<8x8xf32>
    tpu.vector_store %arg8[%c0_18, %c0_19], %24 {strides = array<i32>} : memref<8x8xf32, #tpu.memory_space<vmem>>, vector<8x8xf32>,
    return
  }
  func.func @transform_0(%arg0: i32) -> (i32, i32) {
    %c0_i32 = arith.constant 0 : i32
    %c0_i32_0 = arith.constant 0 : i32
    return %arg0, %c0_i32 : i32, i32
  }
  func.func @transform_1(%arg0: i32) -> (i32, i32) {
    %c0_i32 = arith.constant 0 : i32
    %c0_i32_0 = arith.constant 0 : i32
    %c0_i32_1 = arith.constant 0 : i32
    return %c0_i32, %c0_i32_0 : i32, i32
  }
  func.func @transform_2(%arg0: i32) -> (i32, i32) {
    %c0_i32 = arith.constant 0 : i32
    %c0_i32_0 = arith.constant 0 : i32
    %c0_i32_1 = arith.constant 0 : i32
    return %c0_i32, %c0_i32_0 : i32, i32
  }
  func.func @transform_3(%arg0: i32) -> (i32, i32) {
    %c0_i32 = arith.constant 0 : i32
    %c0_i32_0 = arith.constant 0 : i32
    %c0_i32_1 = arith.constant 0 : i32
    return %c0_i32, %c0_i32_0 : i32, i32
  }
  func.func @transform_4(%arg0: i32) -> (i32, i32) {
    %c0_i32 = arith.constant 0 : i32
    %c0_i32_0 = arith.constant 0 : i32
    %c0_i32_1 = arith.constant 0 : i32
    return %c0_i32, %c0_i32_0 : i32, i32
  }
  func.func @transform_5(%arg0: i32) -> (i32, i32) {
    %c0_i32 = arith.constant 0 : i32
    %c0_i32_0 = arith.constant 0 : i32
    %c0_i32_1 = arith.constant 0 : i32
    return %c0_i32, %c0_i32_0 : i32, i32
  }
  func.func @transform_6(%arg0: i32) -> (i32, i32) {
    %c0_i32 = arith.constant 0 : i32
    %c0_i32_0 = arith.constant 0 : i32
    %c0_i32_1 = arith.constant 0 : i32
    return %c0_i32, %c0_i32_0 : i32, i32
  }
  func.func @transform_7(%arg0: i32) -> (i32, i32) {
    %c0_i32 = arith.constant 0 : i32
    %c0_i32_0 = arith.constant 0 : i32
    return %c0_i32, %arg0 : i32, i32
  }
}

</mosaic_0001>

<bundles_post_ra>
// kernel: tpu_custom_call.1
= control target key start
LH: loop header
LB: loop body
LE: loop exit
PB: predicated region body
PF: predicated region fallthrough
CT: control target
= control target key end

     0   :  { %vm93_vm0 = vcmask 261120   ;;  %v704_v3 = vmov 0   ;;  %s885_s0 = inlined_call_operand.vmem [shape: f32[8,32], index: 0, kind: input, shape index: {}]   ;;  %s886_s1 = inlined_call_operand.vmem [shape: f32[64,32], index: 1, kind: input, shape index: {}]   ;;  %s887_s2 = inlined_call_operand.vmem [shape: f32[64,1], index: 2, kind: input, shape index: {}]   ;;  %s888_s3 = inlined_call_operand.vmem [shape: f32[64,64], index: 3, kind: input, shape index: {}]   ;;  %s889_s4 = inlined_call_operand.vmem [shape: f32[64,1], index: 4, kind: input, shape index: {}]   ;;  %s890_s5 = inlined_call_operand.vmem [shape: f32[8,64], index: 5, kind: input, shape index: {}]   ;;  %s891_s6 = inlined_call_operand.vmem [shape: f32[8,1], index: 6, kind: input, shape index: {}]   ;;  %s892_s7 = inlined_call_operand.hbm [shape: f32[8,8], index: 7, kind: output, shape index: {}]  }
   0x1   :  { %v27_v0 = vld [vmem:[%s885_s0] sm:$0xff]  ;;  %v29_v2 = vld [vmem:[%s886_s1 + $0x8] sm:$0xff]  ;;  %674 = vset.pattern.permute.xlu0 %v704_v3  ;;  %v30_v4 = vld [vmem:[%s886_s1 + $0x10] sm:$0xff]  ;;  %675 = vset.pattern.permute.xlu1 %v704_v3 }
   0x2   :  { %v28_v1 = vld [vmem:[%s886_s1] sm:$0xff]  ;;  %580 = vmatprep.subr.msk.mxu0 %vm93_vm0, %v27_v0  ;;  %v47_v6 = vld [vmem:[%s887_s2 + $0x10] sm:$0xff]  ;;  %v46_v7 = vld [vmem:[%s887_s2 + $0x8] sm:$0xff] }
   0x3   :  { %582 = vmatprep.mubr.msk.f32.mxu0 %vm93_vm0, %v28_v1  ;;  %581 = vmatpush3.xpose.msk.msra.mxu0 %vm93_vm0, %v27_v0  ;;  %v45_v5 = vld [vmem:[%s887_s2] sm:$0xff]  ;;  %v48_v8 = vld [vmem:[%s887_s2 + $0x18] sm:$0xff] }
   0x4   :  { %55 = vperm.xlu0 %674, %v45_v5   ;;  %65 = vperm.xlu1 %675, %v47_v6   ;;  %v31_v9 = vld [vmem:[%s886_s1 + $0x18] sm:$0xff]  ;;  %v32_v10 = vld [vmem:[%s886_s1 + $0x20] sm:$0xff] }
   0x6   :  { %583 = vmatmul.mubr.msk.f32.vlgmr.msra.gmra.mrb[0].mxu0 %vm93_vm0, %v29_v2 }
   0x7   :  { %585 = vmatprep.mubr.msk.f32.mxu0 %vm93_vm0, %v30_v4 }
   0x8   :  { %60 = vperm.xlu0 %674, %v46_v7   ;;  %70 = vperm.xlu1 %675, %v48_v8  }
   0x9   :  { %12 = vsyncpa [#allocation3], 0  ;;  %v49_v11 = vld [vmem:[%s887_s2 + $0x20] sm:$0xff]  ;;  %v50_v12 = vld [vmem:[%s887_s2 + $0x28] sm:$0xff]  ;;  %vm282_vm1 = vcmask 523264   ;;  %v705_v7 = vmov 0.0|0.0  }
   0xa   :  { %586 = vmatmul.mubr.msk.f32.gmra.mrb[2].mxu0 %vm93_vm0, %v31_v9  ;;  %v33_v13 = vld [vmem:[%s886_s1 + $0x28] sm:$0xff]  ;;  %v34_v14 = vld [vmem:[%s886_s1 + $0x30] sm:$0xff]  ;;  %v52_v16 = vld [vmem:[%s887_s2 + $0x38] sm:$0xff]  ;;  %657 = vmatprep.subr.bf16.mxu0 %v705_v7  ;;  %vm706_vm2 = vmmov 0   ;;  %v707_v8 = vmov 0.0   ;;  %vm512_vm4 = vcmask 64512  }
   0xb   :  { %588 = vmatprep.mubr.msk.f32.mxu0 %vm93_vm0, %v32_v10  ;;  %v51_v15 = vld [vmem:[%s887_s2 + $0x30] sm:$0xff]  ;;  %v35_v17 = vld [vmem:[%s886_s1 + $0x38] sm:$0xff]  ;;  %v234_v18 = vld [vmem:[%s889_s4] sm:$0xff]  ;;  %s708_s1 = smov [#allocation2]  }
   0xc   :  { %75 = vperm.xlu0 %674, %v49_v11   ;;  %80 = vperm.xlu1 %675, %v50_v12   ;;  %v235_v19 = vld [vmem:[%s889_s4 + $0x8] sm:$0xff]  ;;  %v236_v20 = vld [vmem:[%s889_s4 + $0x10] sm:$0xff]  ;;  %v237_v21 = vld [vmem:[%s889_s4 + $0x18] sm:$0xff]  ;;  %s520_s16 = sshll.u32 %s708_s1, 4  ;;  %s521_s16 = int_to_ptr.vmem [resolvable:$true] %s520_s16 }
   0xd   :  { %v238_v22 = vld [vmem:[%s889_s4 + $0x20] sm:$0xff]  ;;  %v239_v23 = vld [vmem:[%s889_s4 + $0x28] sm:$0xff]  ;;  %v240_v24 = vld [vmem:[%s889_s4 + $0x30] sm:$0xff]  ;;  %p685_p1 = scmp.lt.s32.totalorder %s521_s16, %s521_s16 }
   0xe   :  { %589 = vmatmul.mubr.msk.f32.gmra.mrb[4].mxu0 %vm93_vm0, %v33_v13  ;;  %v241_v25 = vld [vmem:[%s889_s4 + $0x38] sm:$0xff]  ;;  %v420_v26 = vld [vmem:[%s891_s6] sm:$0xff]  ;;  %v37_v0 = vld [vmem:[%s888_s3 + $0x8] sm:$0xff] }
   0xf   :  { %591 = vmatprep.mubr.msk.f32.mxu0 %vm93_vm0, %v34_v14  ;;  %v36_v27 = vld [vmem:[%s888_s3] sm:$0xff]  ;;  %v38_v1 = vld [vmem:[%s888_s3 + $0x10] sm:$0xff]  ;;  %v39_v2 = vld [vmem:[%s888_s3 + $0x18] sm:$0xff] }
  0x10   :  { %85 = vperm.xlu0 %674, %v51_v15   ;;  %90 = vperm.xlu1 %675, %v52_v16   ;;  %v40_v3 = vld [vmem:[%s888_s3 + $0x20] sm:$0xff]  ;;  %v41_v4 = vld [vmem:[%s888_s3 + $0x28] sm:$0xff]  ;;  %v42_v5 = vld [vmem:[%s888_s3 + $0x30] sm:$0xff] }
  0x11   :  { %610 = vmatprep.mubr.msk.f32.mxu1 %vm282_vm1, %v36_v27  ;;  %v43_v6 = vld [vmem:[%s888_s3 + $0x38] sm:$0xff] }
  0x12   :  { %592 = vmatmul.mubr.msk.f32.gmra.mrb[6].mxu0 %vm93_vm0, %v35_v17 }
  0x13   :  { %638 = vmatprep.mubr.msk.f32.mxu0 %vm706_vm2, %v707_v8 }
  0x14   :  { %244 = vperm.xlu0 %674, %v234_v18   ;;  %249 = vperm.xlu1 %675, %v235_v19  }
  0x18   :  { %254 = vperm.xlu0 %674, %v236_v20   ;;  %259 = vperm.xlu1 %675, %v237_v21  }
  0x1c   :  { %264 = vperm.xlu0 %674, %v238_v22   ;;  %269 = vperm.xlu1 %675, %v239_v23  }
  0x20   :  { %274 = vperm.xlu0 %674, %v240_v24   ;;  %279 = vperm.xlu1 %675, %v241_v25  }
  0x24   :  { %423 = vperm.xlu0 %674, %v420_v26  }
  0x83   :  { %v56_v28 = vpop.permute.xlu0 %55  ;;  %v66_v29 = vpop.permute.xlu1 %65 }
  0x87   :  { %v61_v30 = vpop.permute.xlu0 %60  ;;  %v71_v31 = vpop.permute.xlu1 %70 }
  0x8b   :  { %v81_v41 = vpop.permute.xlu1 %80  ;;  %v76_v44 = vpop.permute.xlu0 %75 }
  0x8f   :  { %v91_v53 = vpop.permute.xlu1 %90  ;;  %v86_v56 = vpop.permute.xlu0 %85 }
  0x93   :  { %v250_v9 = vpop.permute.xlu1 %249  ;;  %v245_v10 = vpop.permute.xlu0 %244 }
  0x97   :  { %v260_v11 = vpop.permute.xlu1 %259  ;;  %v255_v13 = vpop.permute.xlu0 %254 }
  0x9b   :  { %v270_v22 = vpop.permute.xlu1 %269  ;;  %v265_v25 = vpop.permute.xlu0 %264 }
  0xd9   :  { %v584_v32 = vpop.f32.mrb[0].mxu0 }
  0xda   :  { %v193_v33 = vadd.f32 %v584_v32, %v61_v30  ;;  %v187_v34 = vpop.f32.mrb[1].mxu0 }
  0xdb   :  { %v188_v35 = vadd.f32 %v187_v34, %v56_v28  ;;  %v280_v34 = vpop.permute.xlu1 %279 }
  0xdc   :  { %v227_v36 = vmax.f32 %v193_v33, 0.0 }
  0xdd   :  { %v226_v37 = vmax.f32 %v188_v35, 0.0  ;;  %v587_v38 = vpop.f32.mrb[2].mxu0 }
  0xde   :  { %v203_v39 = vadd.f32 %v587_v38, %v71_v31  ;;  %v197_v40 = vpop.f32.mrb[3].mxu0 }
  0xdf   :  { %v198_v42 = vadd.f32 %v197_v40, %v66_v29  ;;  %v641_v43 = vpack.c.bf16 %v227_v36, %v226_v37  ;;  %v275_v37 = vpop.permute.xlu0 %274 }
  0xe0   :  { %v229_v45 = vmax.f32 %v203_v39, 0.0 }
  0xe1   :  { %v228_v46 = vmax.f32 %v198_v42, 0.0  ;;  %v590_v47 = vpop.f32.mrb[4].mxu0  ;;  %642 = vmatprep.subr.bf16.mxu1 %v641_v43 }
  0xe2   :  { %v213_v48 = vadd.f32 %v590_v47, %v81_v41  ;;  %v207_v49 = vpop.f32.mrb[5].mxu0  ;;  %644 = vmatpush3.bf16.msra.mxu1 %v641_v43 }
  0xe3   :  { %v645_v50 = vpack.c.bf16 %v229_v45, %v228_v46  ;;  %v208_v51 = vadd.f32 %v207_v49, %v76_v44  ;;  %v44_v45 = vld [vmem:[%s890_s5] sm:$0xff]  ;;  %v424_v46 = vpop.permute.xlu0 %423  ;;  %s680_s5 = scalar_lea.vmem %s521_s16, 128 }
  0xe4   :  { %v231_v52 = vmax.f32 %v213_v48, 0.0  ;;  %p681_p0 = scmp.ne.s32.totalorder %s521_s16, %s680_s5  ;;  %p686_p2 = scmp.lt.s32.totalorder %s680_s5, %s680_s5 }
  0xe5   :  { %v230_v54 = vmax.f32 %v208_v51, 0.0  ;;  %v593_v55 = vpop.f32.mrb[6].mxu0  ;;  %646 = vmatprep.subr.bf16.mxu1 %v645_v50 }
  0xe6   :  { %v223_v57 = vadd.f32 %v593_v55, %v91_v53  ;;  %v217_v58 = vpop.f32.mrb[7].mxu0  ;;  %648 = vmatpush3.bf16.msra.mxu1 %v645_v50  ;;  %p687_p3 = por %p686_p2, %p685_p1 }
  0xe7   :  { %v649_v59 = vpack.c.bf16 %v231_v52, %v230_v54  ;;  %v218_v60 = vadd.f32 %v217_v58, %v86_v56 }
  0xe8   :  { %v233_v61 = vmax.f32 %v223_v57, 0.0  ;;  %p688_p4 = pnand %p687_p3, %p681_p0 }
  0xe9   :  { %v232_v62 = vmax.f32 %v218_v60, 0.0  ;;  %650 = vmatprep.subr.bf16.mxu1 %v649_v59 }
  0xea   :  { %652 = vmatpush3.bf16.msra.mxu1 %v649_v59 }
  0xeb   :  { %v653_v63 = vpack.c.bf16 %v233_v61, %v232_v62 }
  0xed   :  { %654 = vmatprep.subr.bf16.mxu1 %v653_v63 }
  0xee   :  { %656 = vmatpush3.bf16.msra.mxu1 %v653_v63 }
  0xf1   :  { %611 = vmatmul.mubr.msk.f32.vlgmr.msra.gmra.mrb[0].mxu1 %vm282_vm1, %v37_v0 }
  0xf2   :  { %613 = vmatprep.mubr.msk.f32.mxu1 %vm282_vm1, %v38_v1 }
  0xf5   :  { %614 = vmatmul.mubr.msk.f32.gmra.mrb[2].mxu1 %vm282_vm1, %v39_v2 }
  0xf6   :  { %616 = vmatprep.mubr.msk.f32.mxu1 %vm282_vm1, %v40_v3 }
  0xf9   :  { %617 = vmatmul.mubr.msk.f32.gmra.mrb[4].mxu1 %vm282_vm1, %v41_v4 }
  0xfa   :  { %619 = vmatprep.mubr.msk.f32.mxu1 %vm282_vm1, %v42_v5 }
  0xfd   :  { %620 = vmatmul.mubr.msk.f32.gmra.mrb[6].mxu1 %vm282_vm1, %v43_v6 }
 0x1c4   :  { %v612_v12 = vpop.f32.mrb[0].mxu1 }
 0x1c5   :  { %v379_v14 = vadd.f32 %v612_v12, %v250_v9  ;;  %v373_v15 = vpop.f32.mrb[1].mxu1 }
 0x1c6   :  { %v374_v16 = vadd.f32 %v373_v15, %v245_v10 }
 0x1c7   :  { %v413_v17 = vmax.f32 %v379_v14, 0.0 }
 0x1c8   :  { %v412_v18 = vmax.f32 %v374_v16, 0.0  ;;  %v615_v19 = vpop.f32.mrb[2].mxu1 }
 0x1c9   :  { %v389_v20 = vadd.f32 %v615_v19, %v260_v11  ;;  %v383_v21 = vpop.f32.mrb[3].mxu1 }
 0x1ca   :  { %v658_v23 = vpack.c.bf16 %v413_v17, %v412_v18  ;;  %v384_v24 = vadd.f32 %v383_v21, %v255_v13 }
 0x1cb   :  { %v415_v26 = vmax.f32 %v389_v20, 0.0 }
 0x1cc   :  { %v414_v27 = vmax.f32 %v384_v24, 0.0  ;;  %v618_v28 = vpop.f32.mrb[4].mxu1  ;;  %659 = vmatpush3.bf16.msra.mxu0 %v658_v23 }
 0x1cd   :  { %v399_v29 = vadd.f32 %v618_v28, %v270_v22  ;;  %v393_v30 = vpop.f32.mrb[5].mxu1  ;;  %660 = vmatprep.subr.bf16.mxu0 %v705_v7 }
 0x1ce   :  { %v661_v31 = vpack.c.bf16 %v415_v26, %v414_v27  ;;  %v394_v32 = vadd.f32 %v393_v30, %v265_v25 }
 0x1cf   :  { %v417_v33 = vmax.f32 %v399_v29, 0.0 }
 0x1d0   :  { %v416_v35 = vmax.f32 %v394_v32, 0.0  ;;  %v621_v36 = vpop.f32.mrb[6].mxu1  ;;  %662 = vmatpush3.bf16.msra.mxu0 %v661_v31 }
 0x1d1   :  { %v409_v38 = vadd.f32 %v621_v36, %v280_v34  ;;  %v403_v39 = vpop.f32.mrb[7].mxu1  ;;  %663 = vmatprep.subr.bf16.mxu0 %v705_v7 }
 0x1d2   :  { %v664_v40 = vpack.c.bf16 %v417_v33, %v416_v35  ;;  %v404_v41 = vadd.f32 %v403_v39, %v275_v37 }
 0x1d3   :  { %v419_v42 = vmax.f32 %v409_v38, 0.0 }
 0x1d4   :  { %v418_v43 = vmax.f32 %v404_v41, 0.0  ;;  %665 = vmatpush3.bf16.msra.mxu0 %v664_v40 }
 0x1d5   :  { %666 = vmatprep.subr.bf16.mxu0 %v705_v7 }
 0x1d6   :  { %v667_v44 = vpack.c.bf16 %v419_v42, %v418_v43 }
 0x1d8   :  { %668 = vmatpush3.bf16.msra.mxu0 %v667_v44 }
 0x1db   :  { %639 = vmatmul.mubr.msk.f32.vlgmr.msra.gmra.mrb[8].mxu0 %vm282_vm1, %v44_v45 }
 0x2ae   :  { %v495_v47 = vpop.f32.mrb[8].mxu0 }
 0x2af   :  { %v496_v48 = vadd.f32 %v495_v47, %v424_v46  ;;  %v640_v49 = vpop.f32.mrb[9].mxu0 }
 0x2b1   :  { %v500_v50 = vmul.f32 1.442695, %v496_v48  ;;  %vm499_vm5 = vcmp.gt.f32.partialorder %v496_v48, 20.0 }
 0x2b3   :  { %676 = vpow2.f32 %v500_v50 }
 0x2bd   :  { %v677_v51 = vpop.eup %676 }
 0x2be   :  { %v502_v52 = vadd.f32 1.0, %v677_v51  ;;  %v505_v53 = vmul.f32 -0.5, %v677_v51  ;;  %v508_v55 = vand.u32 2147483647, %v677_v51 }
 0x2c0   :  { %678 = vlog2.f32 %v502_v52  ;;  %v506_v54 = vadd.f32 1.0, %v505_v53  ;;  %vm509_vm3 = vcmp.lt.f32.partialorder %v508_v55, 0.0004427343 }
 0x2c2   :  { %v507_v58 = vmul.f32 %v677_v51, %v506_v54 }
 0x2ca   :  { %v679_v56 = vpop.eup %678 }
 0x2cb   :  { %v504_v57 = vmul.f32 0.6931472, %v679_v56 }
 0x2cd   :  { %v510_v59 = vsel %vm509_vm3, %v507_v58, %v504_v57 }
 0x2ce   :  { %v511_v60 = vsel %vm499_vm5, %v496_v48, %v510_v59 }
 0x2cf   :  { %513 = vst.msk [vmem:[#allocation2] sm:$0xff] %vm512_vm4, %v511_v60 }
 0x2d0   :  { %691 = shalt.err (!%p688_p4)
}
 0x2d1   :  { %s692_s19 = scalar_lea.hbm %s892_s7, 128 }
 0x2d2   :  { %p693_p5 = scmp.ne.s32.totalorder %s892_s7, %s692_s19  ;;  %p696_p6 = scmp.lt.u32.totalorder %s692_s19, %s892_s7 }
 0x2d4   :  { %p698_p7 = pnand %p696_p6, %p693_p5 }
 0x2d6   :  { %701 = shalt.err (!%p698_p7)
}
 0x2d7   :  { %523 = dma.vmem_to_hbm [thread:$0]  %s521_s16, 128, %s892_s7, [#allocation3]  }
 0x2d8   :  { %702 = dma.done.wait [#allocation3], 128  }
 0x2d9   :  { %703 = vsyncadd [#allocation3], 4294967168 }
 0x2da   :  { %527 = vsyncpa [#allocation3], 1 }

</bundles_post_ra>
